<compile_context>
chip_gen: v7x
topology: tpu7x:2x2x1
jax: 0.10.0
libtpu: 0.0.40
codegen_flags: <defaults>
</compile_context>

<pallas_src>
import functools
import math

import jax
import jax.numpy as jnp
from jax.experimental import pallas as pl
from jax.experimental.pallas import tpu as pltpu  # noqa: F401  (TPU backend assumed)

NHEADS = 5
HIDDEN = 32
GAT_OUT = 32
GAT_IN = 55


# ------------------------- Pallas kernels -------------------------

def _matmul_kernel(x_ref, w_ref, o_ref):
    # Plain 2-D matmul (used once: fused edge projection for all 3 layers).
    o_ref[...] = jnp.dot(x_ref[...], w_ref[...],
                         preferred_element_type=jnp.float32)


def edge_projection(x, w):
    m = x.shape[0]
    n = w.shape[1]
    return pl.pallas_call(
        _matmul_kernel,
        out_shape=jax.ShapeDtypeStruct((m, n), jnp.float32),
    )(x, w)


def _conv_bn_kernel(x_ref, w_ref, b_ref, e_ref, mask_ref, g_ref, bb_ref, o_ref,
                    *, heads, c, eps):
    f32 = jnp.float32
    bf16 = jnp.bfloat16
    hc = heads * c

    x = x_ref[...]                                                  # [N, Fin]
    # Fused q|k|v|skip projection: one lane-dense MXU matmul -> [N, 4*H*C].
    proj = jnp.dot(x, w_ref[...], preferred_element_type=f32) + b_ref[...]
    mask = mask_ref[...]                                            # [N, N]
    adj = mask > 0.0                                                # hoisted (once, not per head)
    scale = 1.0 / math.sqrt(c)
    neg = jnp.float32(-1e30)

    head_outs = []
    for h in range(heads):                                          # static unroll
        lo = h * c
        q = proj[:, lo:lo + c]                                      # [N, C]
        k = proj[:, hc + lo:hc + lo + c]
        v = proj[:, 2 * hc + lo:2 * hc + lo + c]
        sk = proj[:, 3 * hc + lo:3 * hc + lo + c]
        eh = e_ref[:, :, lo:lo + c]                                 # [N, N, C]

        # scores[i, j] = q_i . (k_j + W_e e_ij)
        s_qk = jax.lax.dot_general(
            q.astype(bf16), k.astype(bf16),
            (((1,), (1,)), ((), ())),
            preferred_element_type=f32)                             # [N, N] (MXU)
        s_qe = jnp.sum(q[:, None, :] * eh, axis=-1)                 # [N, N] (VPU)
        scores = (s_qk + s_qe) * scale

        # Masked per-target softmax over incoming edges (segment softmax).
        masked = jnp.where(adj, scores, neg)
        m = jnp.max(masked, axis=1, keepdims=True)
        p = jnp.exp(masked - m) * mask
        denom = jnp.sum(p, axis=1, keepdims=True)
        inv = pl.reciprocal(jnp.maximum(denom, 1e-30), approx=True)  # EUP, NaN-free
        alpha = p * inv                                             # [N, N]

        out_h = jax.lax.dot_general(
            alpha.astype(bf16), v.astype(bf16),
            (((1,), (0,)), ((), ())),
            preferred_element_type=f32)                             # alpha @ v (MXU)
        out_h = out_h + jnp.sum(alpha[:, :, None] * eh, axis=1)     # + edge part
        head_outs.append(out_h + sk)                                # + root/skip

    y = jnp.concatenate(head_outs, axis=-1)                         # [N, H*C] lane-dense

    # BatchNorm (training-mode batch statistics, biased variance) + ReLU.
    mean = jnp.mean(y, axis=0, keepdims=True)
    var = jnp.mean((y - mean) ** 2, axis=0, keepdims=True)
    y = (y - mean) * jax.lax.rsqrt(var + eps) * g_ref[...] + bb_ref[...]
    o_ref[...] = jnp.maximum(y, 0.0)


def fused_conv_bn(x, p, e_layer, mask, bn_g, bn_b):
    n = x.shape[0]
    heads, c = p["heads"], p["out_channels"]
    hc = heads * c
    return pl.pallas_call(
        functools.partial(_conv_bn_kernel, heads=heads, c=c, eps=1e-5),
        out_shape=jax.ShapeDtypeStruct((n, hc), jnp.float32),
    )(x, p["w_qkvs"], p["b_qkvs"], e_layer, mask,
      bn_g.reshape(1, hc), bn_b.reshape(1, hc))


def _tail_kernel(pool_ref, x1_ref, x2_ref, x3_ref, g_ref, b_ref,
                 w1_ref, b1_ref, w2_ref, b2_ref, o_ref, *, eps):
    f32 = jnp.float32
    pool = pool_ref[...]                                            # [B, N]
    # global_mean_pool: concat features in VMEM -> ONE lane-dense (480) matmul.
    xcat = jnp.concatenate([x1_ref[...], x2_ref[...], x3_ref[...]], axis=1)
    pooled = jnp.dot(pool, xcat, preferred_element_type=f32)        # [B, 480]
    # BatchNorm(480), training-mode statistics.
    mean = jnp.mean(pooled, axis=0, keepdims=True)
    var = jnp.mean((pooled - mean) ** 2, axis=0, keepdims=True)
    y = (pooled - mean) * jax.lax.rsqrt(var + eps) * g_ref[...] + b_ref[...]
    # fc1 -> OutputLayer: relu -> dropout -> fc2
    feat = jnp.dot(y, w1_ref[...], preferred_element_type=f32) + b1_ref[...]
    feat = jnp.maximum(feat, 0.0)
    # TODO(synk): F.dropout is stochastic in training mode; identity here (eval mode).
    o_ref[...] = jnp.dot(feat, w2_ref[...], preferred_element_type=f32) + b2_ref[...]


def tail(pool_mat, x1, x2, x3, params):
    b = pool_mat.shape[0]
    num_classes = params["fc2_w"].shape[1]
    return pl.pallas_call(
        functools.partial(_tail_kernel, eps=1e-5),
        out_shape=jax.ShapeDtypeStruct((b, num_classes), jnp.float32),
    )(pool_mat, x1, x2, x3,
      params["bn_pool_g"].reshape(1, -1), params["bn_pool_b"].reshape(1, -1),
      params["fc1_w"], params["fc1_b"].reshape(1, -1),
      params["fc2_w"], params["fc2_b"].reshape(1, -1))


# ------------------------- parameter init -------------------------

def init_linear_params(key, fan_in, fan_out, bias=True):
    kw, kb = jax.random.split(key)
    lim = 1.0 / math.sqrt(fan_in)
    w = jax.random.uniform(kw, (fan_in, fan_out), jnp.float32, -lim, lim)
    if bias:
        b = jax.random.uniform(kb, (fan_out,), jnp.float32, -lim, lim)
    else:
        b = jnp.zeros((fan_out,), jnp.float32)
    return w, b


def init_transformer_conv(key, in_dim, out_channels, heads, edge_dim):
    ks = jax.random.split(key, 5)
    hc = heads * out_channels
    wq, bq = init_linear_params(ks[0], in_dim, hc)
    wk, bk = init_linear_params(ks[1], in_dim, hc)
    wv, bv = init_linear_params(ks[2], in_dim, hc)
    we, _ = init_linear_params(ks[3], edge_dim, hc, bias=False)     # lin_edge: no bias
    ws, bs = init_linear_params(ks[4], in_dim, hc)                  # lin_skip
    # Fused q|k|v|skip weight/bias: one [Fin, 4*H*C] matmul per layer.
    w_qkvs = jnp.concatenate([wq, wk, wv, ws], axis=1)
    b_qkvs = jnp.concatenate([bq, bk, bv, bs]).reshape(1, 4 * hc)
    return dict(w_qkvs=w_qkvs, b_qkvs=b_qkvs, we=we,
                heads=heads, out_channels=out_channels)


def init_model(key, edge_dim, num_classes):
    ks = jax.random.split(key, 8)
    p = {}
    p["conv1"] = init_transformer_conv(ks[0], GAT_IN, HIDDEN, NHEADS, edge_dim)
    p["conv2"] = init_transformer_conv(ks[1], NHEADS * HIDDEN, GAT_OUT, NHEADS, edge_dim)
    p["conv3"] = init_transformer_conv(ks[2], NHEADS * GAT_OUT, GAT_OUT, NHEADS, edge_dim)
    # One fused edge-projection weight covering all three layers.
    p["we_all"] = jnp.concatenate(
        [p["conv1"]["we"], p["conv2"]["we"], p["conv3"]["we"]], axis=1)
    for name, dim in (("bn1", NHEADS * HIDDEN), ("bn2", NHEADS * GAT_OUT),
                      ("bn3", NHEADS * GAT_OUT), ("bn_pool", 480)):
        p[name + "_g"] = jnp.ones((dim,), jnp.float32)
        p[name + "_b"] = jnp.zeros((dim,), jnp.float32)
    p["fc1_w"], p["fc1_b"] = init_linear_params(ks[3], 480, 64)
    p["fc2_w"], p["fc2_b"] = init_linear_params(ks[4], 64, num_classes)
    return p


# ------------------------- forward pass -------------------------

def ftd_graph_forward(params, x, edge_index, edge_attr, batch, num_graphs):
    n = x.shape[0]
    x_flat = x.reshape(n, -1)                                       # torch.flatten(X, 1)
    edge_dim = edge_attr.shape[-1]
    src, dst = edge_index[0], edge_index[1]                         # messages src -> dst

    # Densify the graph (glue): adjacency mask + per-pair edge features.
    mask = jnp.zeros((n, n), jnp.float32).at[dst, src].set(1.0)
    edge_dense = jnp.zeros((n, n, edge_dim), jnp.float32).at[dst, src].set(edge_attr)

    # Single fused edge projection for all three conv layers.
    hc1 = NHEADS * HIDDEN
    hc2 = NHEADS * GAT_OUT
    hc3 = NHEADS * GAT_OUT
    e_all = edge_projection(edge_dense.reshape(n * n, edge_dim), params["we_all"])
    e_all = e_all.reshape(n, n, hc1 + hc2 + hc3)
    e1 = e_all[:, :, :hc1]
    e2 = e_all[:, :, hc1:hc1 + hc2]
    e3 = e_all[:, :, hc1 + hc2:]

    # GATblock: (TransformerConv + BN + ReLU) fused into one kernel per layer.
    x1 = fused_conv_bn(x_flat, params["conv1"], e1, mask, params["bn1_g"], params["bn1_b"])
    x2 = fused_conv_bn(x1, params["conv2"], e2, mask, params["bn2_g"], params["bn2_b"])
    x3 = fused_conv_bn(x2, params["conv3"], e3, mask, params["bn3_g"], params["bn3_b"])

    # global_mean_pool as a normalized one-hot matmul (inside the tail kernel).
    onehot = (batch[None, :] == jnp.arange(num_graphs)[:, None]).astype(jnp.float32)
    counts = jnp.maximum(jnp.sum(onehot, axis=1, keepdims=True), 1.0)
    pool_mat = onehot / counts                                      # [B, N]

    # Fused epilogue: concat + pool matmul + BN(480) + fc1 + ReLU + fc2.
    return tail(pool_mat, x1, x2, x3, params)


# ------------------------- demo -------------------------

if __name__ == "__main__":
    key = jax.random.PRNGKey(0)

    num_signals, timepoints, num_conns = 5, 11, 2     # 5*11 = 55 = GATin
    num_nodes_per_graph, num_graphs = 8, 2
    edge_dim = num_conns * num_signals                # self.num_edges = num_conns*num_signals
    num_classes = 3
    n_total = num_nodes_per_graph * num_graphs

    k_model, k_x, k_attr = jax.random.split(key, 3)
    params = init_model(k_model, edge_dim, num_classes)

    x = jax.random.normal(k_x, (n_total, num_signals, timepoints), jnp.float32)

    # Bidirectional ring within each graph (every node has incoming edges).
    src, dst = [], []
    for g in range(num_graphs):
        off = g * num_nodes_per_graph
        for i in range(num_nodes_per_graph):
            j = (i + 1) % num_nodes_per_graph
            src += [off + i, off + j]
            dst += [off + j, off + i]
    edge_index = jnp.array([src, dst], dtype=jnp.int32)             # [2, E]
    edge_attr = jax.random.normal(k_attr, (edge_index.shape[1], edge_dim), jnp.float32)
    batch = jnp.repeat(jnp.arange(num_graphs, dtype=jnp.int32), num_nodes_per_graph)

    out = ftd_graph_forward(params, x, edge_index, edge_attr, batch, num_graphs)
    out = jax.block_until_ready(out)
    assert out.shape == (num_graphs, num_classes)
    assert bool(jnp.all(jnp.isfinite(out)))
    print("KERNEL_OK")
</pallas_src>

<mosaic_0001>
module attributes {stable_mosaic.version = 11 : i64} {
  func.func @_matmul_kernel(%arg0: memref<256x10xf32, #tpu.memory_space<vmem>>, %arg1: memref<10x480xf32, #tpu.memory_space<vmem>>, %arg2: memref<256x480xf32, #tpu.memory_space<vmem>>) attributes {dimension_semantics = [], scalar_prefetch = 0 : i64, scratch_operands = 0 : i64, tpu.core_type = #tpu.core_type<tc>} {
    %c0 = arith.constant 0 : index
    %c0_0 = arith.constant 0 : index
    %0 = vector.load %arg0[%c0, %c0_0] : memref<256x10xf32, #tpu.memory_space<vmem>>, vector<256x10xf32>
    %c0_1 = arith.constant 0 : index
    %c0_2 = arith.constant 0 : index
    %1 = vector.load %arg1[%c0_1, %c0_2] : memref<10x480xf32, #tpu.memory_space<vmem>>, vector<10x480xf32>
    %cst = arith.constant dense<0.000000e+00> : vector<256x480xf32>
    %2 = tpu.matmul %0, %1, %cst {dimension_numbers = #tpu.dot_dimension_numbers<[1], [0], [0], [1], [0, 0, 1, 1], [], []>} : vector<256x10xf32>, vector<10x480xf32>, vector<256x480xf32> -> vector<256x480xf32>
    %c0_3 = arith.constant 0 : index
    %c0_4 = arith.constant 0 : index
    %3 = vector.load %arg2[%c0_3, %c0_4] : memref<256x480xf32, #tpu.memory_space<vmem>>, vector<256x480xf32>
    tpu.vector_store %arg2[%c0_3, %c0_4], %2 {strides = array<i32>} : memref<256x480xf32, #tpu.memory_space<vmem>>, vector<256x480xf32>,
    return
  }
}

</mosaic_0001>

<bundles_post_ra>
// kernel: tpu_custom_call.1
= control target key start
LH: loop header
LB: loop body
LE: loop exit
PB: predicated region body
PF: predicated region fallthrough
CT: control target
= control target key end

     0   :  { %vm148_vm0 = vcmask 1041408   ;;  %vm890_vm1 = vmmov 1   ;;  %v891_v3 = vmov 0.0   ;;  %vm51_vm3 = vcmask 80896   ;;  %s1583_s1 = inlined_call_operand.vmem [shape: f32[10,480], index: 1, kind: input, shape index: {}]   ;;  %s1584_s0 = inlined_call_operand.vmem [shape: f32[256,10], index: 0, kind: input, shape index: {}]   ;;  %s1585_s2 = inlined_call_operand.vmem [shape: f32[256,480], index: 2, kind: output, shape index: {}]  }
   0x1   :  { %v44_v0 = vld [vmem:[%s1583_s1 + $0x8] sm:$0xff]  ;;  %vm913_vm2 = vmpackc.low %vm148_vm0, %vm890_vm1  ;;  %225 = vmatprep.mubr.f32.mxu0 %v891_v3  ;;  %482 = vmatprep.mubr.f32.mxu1 %v891_v3  ;;  %v46_v5 = vld [vmem:[%s1583_s1 + $0x18] sm:$0xff]  ;;  %vm678_vm4 = vcmask 785408  }
   0x2   :  { %v48_v1 = vld [vmem:[%s1583_s1 + $0x28] sm:$0x3]  ;;  %v50_v6 = vld [vmem:[%s1583_s1 + $0x38] sm:$0x3]  ;;  %v43_v7 = vld [vmem:[%s1583_s1] sm:$0xff] }
   0x3   :  { %v876_v4 = vpack.c.bf16 %v48_v1, %v44_v0  ;;  %v882_v8 = vpack.c.bf16 %v50_v6, %v46_v5  ;;  %v47_v9 = vld [vmem:[%s1583_s1 + $0x20] sm:$0x3]  ;;  %v45_v10 = vld [vmem:[%s1583_s1 + $0x10] sm:$0xff]  ;;  %v12_v15 = vld [vmem:[%s1584_s0 + $0x8] sm:$0xff] }
   0x4   :  { %v49_v11 = vld [vmem:[%s1583_s1 + $0x30] sm:$0x3]  ;;  %v879_v12 = vpack.c.bf16 %v47_v9, %v43_v7  ;;  %v11_v14 = vld [vmem:[%s1584_s0] sm:$0xff]  ;;  %v14_v17 = vld [vmem:[%s1584_s0 + $0x18] sm:$0xff] }
   0x5   :  { %878 = vmatprep.subr.msk.bf16.mxu0 %vm913_vm2, %v876_v4  ;;  %v885_v13 = vpack.c.bf16 %v49_v11, %v45_v10  ;;  %884 = vmatprep.subr.msk.bf16.mxu1 %vm913_vm2, %v882_v8  ;;  %v13_v16 = vld [vmem:[%s1584_s0 + $0x10] sm:$0xff]  ;;  %v15_v18 = vld [vmem:[%s1584_s0 + $0x20] sm:$0xff]  ;;  %v16_v19 = vld [vmem:[%s1584_s0 + $0x28] sm:$0xff] }
   0x6   :  { %881 = vmatpush1.bf16.msk.msra.mxu0 %vm913_vm2, %v879_v12  ;;  %v17_v20 = vld [vmem:[%s1584_s0 + $0x30] sm:$0xff]  ;;  %v18_v21 = vld [vmem:[%s1584_s0 + $0x38] sm:$0xff]  ;;  %v19_v22 = vld [vmem:[%s1584_s0 + $0x40] sm:$0xff] }
   0x7   :  { %887 = vmatpush1.bf16.msk.msra.mxu1 %vm913_vm2, %v885_v13  ;;  %v20_v23 = vld [vmem:[%s1584_s0 + $0x48] sm:$0xff]  ;;  %v21_v24 = vld [vmem:[%s1584_s0 + $0x50] sm:$0xff]  ;;  %v22_v25 = vld [vmem:[%s1584_s0 + $0x58] sm:$0xff] }
   0x8   :  { %v23_v26 = vld [vmem:[%s1584_s0 + $0x60] sm:$0xff]  ;;  %v24_v27 = vld [vmem:[%s1584_s0 + $0x68] sm:$0xff]  ;;  %v25_v28 = vld [vmem:[%s1584_s0 + $0x70] sm:$0xff] }
   0x9   :  { %810 = vmatmul.mubr.msk.f32.vlgmr.msra.gmra.mrb[0].mxu0 %vm51_vm3, %v11_v14  ;;  %v26_v29 = vld [vmem:[%s1584_s0 + $0x78] sm:$0xff]  ;;  %v27_v30 = vld [vmem:[%s1584_s0 + $0x80] sm:$0xff]  ;;  %v28_v31 = vld [vmem:[%s1584_s0 + $0x88] sm:$0xff] }
   0xa   :  { %844 = vmatmul.mubr.msk.f32.vlgmr.msra.gmra.mrb[0].mxu1 %vm51_vm3, %v11_v14  ;;  %231 = vmatprep.mubr.f32.mxu0 %v891_v3  ;;  %v29_v32 = vld [vmem:[%s1584_s0 + $0x90] sm:$0xff]  ;;  %v30_v33 = vld [vmem:[%s1584_s0 + $0x98] sm:$0xff]  ;;  %v31_v34 = vld [vmem:[%s1584_s0 + $0xa0] sm:$0xff] }
   0xb   :  { %488 = vmatprep.mubr.f32.mxu1 %v891_v3  ;;  %v32_v35 = vld [vmem:[%s1584_s0 + $0xa8] sm:$0xff]  ;;  %v33_v36 = vld [vmem:[%s1584_s0 + $0xb0] sm:$0xff]  ;;  %v34_v37 = vld [vmem:[%s1584_s0 + $0xb8] sm:$0xff] }
   0xc   :  { %v35_v38 = vld [vmem:[%s1584_s0 + $0xc0] sm:$0xff]  ;;  %v36_v39 = vld [vmem:[%s1584_s0 + $0xc8] sm:$0xff]  ;;  %v37_v40 = vld [vmem:[%s1584_s0 + $0xd0] sm:$0xff] }
   0xd   :  { %811 = vmatmul.mubr.msk.f32.gmra.mrb[2].mxu0 %vm51_vm3, %v12_v15  ;;  %v38_v41 = vld [vmem:[%s1584_s0 + $0xd8] sm:$0xff]  ;;  %v39_v42 = vld [vmem:[%s1584_s0 + $0xe0] sm:$0xff]  ;;  %v40_v43 = vld [vmem:[%s1584_s0 + $0xe8] sm:$0xff] }
   0xe   :  { %845 = vmatmul.mubr.msk.f32.gmra.mrb[2].mxu1 %vm51_vm3, %v12_v15  ;;  %237 = vmatprep.mubr.f32.mxu0 %v891_v3  ;;  %v41_v44 = vld [vmem:[%s1584_s0 + $0xf0] sm:$0xff]  ;;  %v42_v45 = vld [vmem:[%s1584_s0 + $0xf8] sm:$0xff] }
   0xf   :  { %494 = vmatprep.mubr.f32.mxu1 %v891_v3 }
  0x11   :  { %812 = vmatmul.mubr.msk.f32.gmra.mrb[4].mxu0 %vm51_vm3, %v13_v16 }
  0x12   :  { %846 = vmatmul.mubr.msk.f32.gmra.mrb[4].mxu1 %vm51_vm3, %v13_v16  ;;  %243 = vmatprep.mubr.f32.mxu0 %v891_v3 }
  0x13   :  { %500 = vmatprep.mubr.f32.mxu1 %v891_v3 }
  0x15   :  { %813 = vmatmul.mubr.msk.f32.gmra.mrb[6].mxu0 %vm51_vm3, %v14_v17 }
  0x16   :  { %847 = vmatmul.mubr.msk.f32.gmra.mrb[6].mxu1 %vm51_vm3, %v14_v17  ;;  %249 = vmatprep.mubr.f32.mxu0 %v891_v3 }
  0x17   :  { %506 = vmatprep.mubr.f32.mxu1 %v891_v3 }
  0x19   :  { %814 = vmatmul.mubr.msk.f32.gmra.mrb[8].mxu0 %vm51_vm3, %v15_v18 }
  0x1a   :  { %848 = vmatmul.mubr.msk.f32.gmra.mrb[8].mxu1 %vm51_vm3, %v15_v18  ;;  %255 = vmatprep.mubr.f32.mxu0 %v891_v3 }
  0x1b   :  { %512 = vmatprep.mubr.f32.mxu1 %v891_v3 }
  0x1d   :  { %815 = vmatmul.mubr.msk.f32.gmra.mrb[10].mxu0 %vm51_vm3, %v16_v19 }
  0x1e   :  { %849 = vmatmul.mubr.msk.f32.gmra.mrb[10].mxu1 %vm51_vm3, %v16_v19  ;;  %261 = vmatprep.mubr.f32.mxu0 %v891_v3 }
  0x1f   :  { %518 = vmatprep.mubr.f32.mxu1 %v891_v3 }
  0x21   :  { %816 = vmatmul.mubr.msk.f32.gmra.mrb[12].mxu0 %vm51_vm3, %v17_v20 }
  0x22   :  { %850 = vmatmul.mubr.msk.f32.gmra.mrb[12].mxu1 %vm51_vm3, %v17_v20  ;;  %267 = vmatprep.mubr.f32.mxu0 %v891_v3 }
  0x23   :  { %524 = vmatprep.mubr.f32.mxu1 %v891_v3 }
  0x25   :  { %817 = vmatmul.mubr.msk.f32.gmra.mrb[14].mxu0 %vm51_vm3, %v18_v21 }
  0x26   :  { %851 = vmatmul.mubr.msk.f32.gmra.mrb[14].mxu1 %vm51_vm3, %v18_v21  ;;  %273 = vmatprep.mubr.f32.mxu0 %v891_v3 }
  0x27   :  { %530 = vmatprep.mubr.f32.mxu1 %v891_v3 }
  0x29   :  { %818 = vmatmul.mubr.msk.f32.gmra.mrb[16].mxu0 %vm51_vm3, %v19_v22 }
  0x2a   :  { %852 = vmatmul.mubr.msk.f32.gmra.mrb[16].mxu1 %vm51_vm3, %v19_v22  ;;  %279 = vmatprep.mubr.f32.mxu0 %v891_v3 }
  0x2b   :  { %536 = vmatprep.mubr.f32.mxu1 %v891_v3 }
  0x2d   :  { %819 = vmatmul.mubr.msk.f32.gmra.mrb[18].mxu0 %vm51_vm3, %v20_v23 }
  0x2e   :  { %853 = vmatmul.mubr.msk.f32.gmra.mrb[18].mxu1 %vm51_vm3, %v20_v23  ;;  %285 = vmatprep.mubr.f32.mxu0 %v891_v3 }
  0x2f   :  { %542 = vmatprep.mubr.f32.mxu1 %v891_v3 }
  0x31   :  { %820 = vmatmul.mubr.msk.f32.gmra.mrb[20].mxu0 %vm51_vm3, %v21_v24 }
  0x32   :  { %854 = vmatmul.mubr.msk.f32.gmra.mrb[20].mxu1 %vm51_vm3, %v21_v24  ;;  %291 = vmatprep.mubr.f32.mxu0 %v891_v3 }
  0x33   :  { %548 = vmatprep.mubr.f32.mxu1 %v891_v3 }
  0x35   :  { %821 = vmatmul.mubr.msk.f32.gmra.mrb[22].mxu0 %vm51_vm3, %v22_v25 }
  0x36   :  { %855 = vmatmul.mubr.msk.f32.gmra.mrb[22].mxu1 %vm51_vm3, %v22_v25  ;;  %297 = vmatprep.mubr.f32.mxu0 %v891_v3 }
  0x37   :  { %554 = vmatprep.mubr.f32.mxu1 %v891_v3 }
  0x39   :  { %822 = vmatmul.mubr.msk.f32.gmra.mrb[24].mxu0 %vm51_vm3, %v23_v26 }
  0x3a   :  { %856 = vmatmul.mubr.msk.f32.gmra.mrb[24].mxu1 %vm51_vm3, %v23_v26  ;;  %303 = vmatprep.mubr.f32.mxu0 %v891_v3 }
  0x3b   :  { %560 = vmatprep.mubr.f32.mxu1 %v891_v3 }
  0x3d   :  { %823 = vmatmul.mubr.msk.f32.gmra.mrb[26].mxu0 %vm51_vm3, %v24_v27 }
  0x3e   :  { %857 = vmatmul.mubr.msk.f32.gmra.mrb[26].mxu1 %vm51_vm3, %v24_v27  ;;  %309 = vmatprep.mubr.f32.mxu0 %v891_v3 }
  0x3f   :  { %566 = vmatprep.mubr.f32.mxu1 %v891_v3 }
  0x41   :  { %824 = vmatmul.mubr.msk.f32.gmra.mrb[28].mxu0 %vm51_vm3, %v25_v28 }
  0x42   :  { %858 = vmatmul.mubr.msk.f32.gmra.mrb[28].mxu1 %vm51_vm3, %v25_v28  ;;  %315 = vmatprep.mubr.f32.mxu0 %v891_v3 }
  0x43   :  { %572 = vmatprep.mubr.f32.mxu1 %v891_v3 }
  0x45   :  { %825 = vmatmul.mubr.msk.f32.gmra.mrb[30].mxu0 %vm51_vm3, %v26_v29 }
  0x46   :  { %859 = vmatmul.mubr.msk.f32.gmra.mrb[30].mxu1 %vm51_vm3, %v26_v29  ;;  %321 = vmatprep.mubr.f32.mxu0 %v891_v3 }
  0x47   :  { %578 = vmatprep.mubr.f32.mxu1 %v891_v3 }
  0x49   :  { %826 = vmatmul.mubr.msk.f32.gmra.mrb[32].mxu0 %vm51_vm3, %v27_v30 }
  0x4a   :  { %860 = vmatmul.mubr.msk.f32.gmra.mrb[32].mxu1 %vm51_vm3, %v27_v30  ;;  %327 = vmatprep.mubr.f32.mxu0 %v891_v3 }
  0x4b   :  { %584 = vmatprep.mubr.f32.mxu1 %v891_v3 }
  0x4d   :  { %827 = vmatmul.mubr.msk.f32.gmra.mrb[34].mxu0 %vm51_vm3, %v28_v31 }
  0x4e   :  { %861 = vmatmul.mubr.msk.f32.gmra.mrb[34].mxu1 %vm51_vm3, %v28_v31  ;;  %333 = vmatprep.mubr.f32.mxu0 %v891_v3 }
  0x4f   :  { %590 = vmatprep.mubr.f32.mxu1 %v891_v3 }
  0x51   :  { %828 = vmatmul.mubr.msk.f32.gmra.mrb[36].mxu0 %vm51_vm3, %v29_v32 }
  0x52   :  { %862 = vmatmul.mubr.msk.f32.gmra.mrb[36].mxu1 %vm51_vm3, %v29_v32  ;;  %339 = vmatprep.mubr.f32.mxu0 %v891_v3 }
  0x53   :  { %596 = vmatprep.mubr.f32.mxu1 %v891_v3 }
  0x55   :  { %829 = vmatmul.mubr.msk.f32.gmra.mrb[38].mxu0 %vm51_vm3, %v30_v33 }
  0x56   :  { %863 = vmatmul.mubr.msk.f32.gmra.mrb[38].mxu1 %vm51_vm3, %v30_v33  ;;  %345 = vmatprep.mubr.f32.mxu0 %v891_v3 }
  0x57   :  { %602 = vmatprep.mubr.f32.mxu1 %v891_v3 }
  0x59   :  { %830 = vmatmul.mubr.msk.f32.gmra.mrb[40].mxu0 %vm51_vm3, %v31_v34 }
  0x5a   :  { %864 = vmatmul.mubr.msk.f32.gmra.mrb[40].mxu1 %vm51_vm3, %v31_v34  ;;  %351 = vmatprep.mubr.f32.mxu0 %v891_v3 }
  0x5b   :  { %608 = vmatprep.mubr.f32.mxu1 %v891_v3 }
  0x5d   :  { %831 = vmatmul.mubr.msk.f32.gmra.mrb[42].mxu0 %vm51_vm3, %v32_v35 }
  0x5e   :  { %865 = vmatmul.mubr.msk.f32.gmra.mrb[42].mxu1 %vm51_vm3, %v32_v35  ;;  %357 = vmatprep.mubr.f32.mxu0 %v891_v3 }
  0x5f   :  { %614 = vmatprep.mubr.f32.mxu1 %v891_v3 }
  0x61   :  { %832 = vmatmul.mubr.msk.f32.gmra.mrb[44].mxu0 %vm51_vm3, %v33_v36 }
  0x62   :  { %866 = vmatmul.mubr.msk.f32.gmra.mrb[44].mxu1 %vm51_vm3, %v33_v36  ;;  %363 = vmatprep.mubr.f32.mxu0 %v891_v3 }
  0x63   :  { %620 = vmatprep.mubr.f32.mxu1 %v891_v3 }
  0x65   :  { %833 = vmatmul.mubr.msk.f32.gmra.mrb[46].mxu0 %vm51_vm3, %v34_v37 }
  0x66   :  { %867 = vmatmul.mubr.msk.f32.gmra.mrb[46].mxu1 %vm51_vm3, %v34_v37  ;;  %369 = vmatprep.mubr.f32.mxu0 %v891_v3 }
  0x67   :  { %626 = vmatprep.mubr.f32.mxu1 %v891_v3 }
  0x69   :  { %834 = vmatmul.mubr.msk.f32.gmra.mrb[48].mxu0 %vm51_vm3, %v35_v38 }
  0x6a   :  { %868 = vmatmul.mubr.msk.f32.gmra.mrb[48].mxu1 %vm51_vm3, %v35_v38  ;;  %375 = vmatprep.mubr.f32.mxu0 %v891_v3 }
  0x6b   :  { %632 = vmatprep.mubr.f32.mxu1 %v891_v3 }
  0x6d   :  { %835 = vmatmul.mubr.msk.f32.gmra.mrb[50].mxu0 %vm51_vm3, %v36_v39 }
  0x6e   :  { %869 = vmatmul.mubr.msk.f32.gmra.mrb[50].mxu1 %vm51_vm3, %v36_v39  ;;  %381 = vmatprep.mubr.f32.mxu0 %v891_v3 }
  0x6f   :  { %638 = vmatprep.mubr.f32.mxu1 %v891_v3 }
  0x71   :  { %836 = vmatmul.mubr.msk.f32.gmra.mrb[52].mxu0 %vm51_vm3, %v37_v40 }
  0x72   :  { %870 = vmatmul.mubr.msk.f32.gmra.mrb[52].mxu1 %vm51_vm3, %v37_v40  ;;  %387 = vmatprep.mubr.f32.mxu0 %v891_v3 }
  0x73   :  { %644 = vmatprep.mubr.f32.mxu1 %v891_v3 }
  0x75   :  { %837 = vmatmul.mubr.msk.f32.gmra.mrb[54].mxu0 %vm51_vm3, %v38_v41 }
  0x76   :  { %871 = vmatmul.mubr.msk.f32.gmra.mrb[54].mxu1 %vm51_vm3, %v38_v41  ;;  %393 = vmatprep.mubr.f32.mxu0 %v891_v3 }
  0x77   :  { %650 = vmatprep.mubr.f32.mxu1 %v891_v3 }
  0x79   :  { %838 = vmatmul.mubr.msk.f32.gmra.mrb[56].mxu0 %vm51_vm3, %v39_v42 }
  0x7a   :  { %872 = vmatmul.mubr.msk.f32.gmra.mrb[56].mxu1 %vm51_vm3, %v39_v42  ;;  %399 = vmatprep.mubr.f32.mxu0 %v891_v3 }
  0x7b   :  { %656 = vmatprep.mubr.f32.mxu1 %v891_v3 }
  0x7d   :  { %839 = vmatmul.mubr.msk.f32.gmra.mrb[58].mxu0 %vm51_vm3, %v40_v43 }
  0x7e   :  { %873 = vmatmul.mubr.msk.f32.gmra.mrb[58].mxu1 %vm51_vm3, %v40_v43  ;;  %405 = vmatprep.mubr.f32.mxu0 %v891_v3 }
  0x7f   :  { %662 = vmatprep.mubr.f32.mxu1 %v891_v3 }
  0x81   :  { %840 = vmatmul.mubr.msk.f32.gmra.mrb[60].mxu0 %vm51_vm3, %v41_v44 }
  0x82   :  { %874 = vmatmul.mubr.msk.f32.gmra.mrb[60].mxu1 %vm51_vm3, %v41_v44  ;;  %411 = vmatprep.mubr.f32.mxu0 %v891_v3 }
  0x83   :  { %668 = vmatprep.mubr.f32.mxu1 %v891_v3 }
  0x85   :  { %841 = vmatmul.mubr.msk.f32.gmra.mrb[62].mxu0 %vm51_vm3, %v42_v45 }
  0x86   :  { %875 = vmatmul.mubr.msk.f32.gmra.mrb[62].mxu1 %vm51_vm3, %v42_v45 }
  0xdc   :  { %v227_v46 = vpop.f32.mrb[0].mxu0 }
  0xdd   :  { %v484_v47 = vpop.f32.mrb[0].mxu1  ;;  %675 = vst [vmem:[%s1585_s2] sm:$0xff] %v227_v46  ;;  %v229_v48 = vpop.f32.mrb[1].mxu0 }
  0xde   :  { %677 = vst [vmem:[%s1585_s2 + $0x10] sm:$0xff] %v484_v47  ;;  %v486_v49 = vpop.f32.mrb[1].mxu1  ;;  %676 = vst [vmem:[%s1585_s2 + $0x8] sm:$0xff] %v229_v48 }
  0xdf   :  { %679 = vst.msk [vmem:[%s1585_s2 + $0x18] sm:$0xff] %vm678_vm4, %v486_v49 }
  0xe0   :  { %v233_v50 = vpop.f32.mrb[2].mxu0 }
  0xe1   :  { %v490_v51 = vpop.f32.mrb[2].mxu1  ;;  %680 = vst [vmem:[%s1585_s2 + $0x20] sm:$0xff] %v233_v50  ;;  %v235_v52 = vpop.f32.mrb[3].mxu0 }
  0xe2   :  { %682 = vst [vmem:[%s1585_s2 + $0x30] sm:$0xff] %v490_v51  ;;  %v492_v53 = vpop.f32.mrb[3].mxu1  ;;  %681 = vst [vmem:[%s1585_s2 + $0x28] sm:$0xff] %v235_v52 }
  0xe3   :  { %683 = vst.msk [vmem:[%s1585_s2 + $0x38] sm:$0xff] %vm678_vm4, %v492_v53 }
  0xe4   :  { %v239_v54 = vpop.f32.mrb[4].mxu0 }
  0xe5   :  { %v496_v55 = vpop.f32.mrb[4].mxu1  ;;  %684 = vst [vmem:[%s1585_s2 + $0x40] sm:$0xff] %v239_v54  ;;  %v241_v56 = vpop.f32.mrb[5].mxu0 }
  0xe6   :  { %686 = vst [vmem:[%s1585_s2 + $0x50] sm:$0xff] %v496_v55  ;;  %v498_v57 = vpop.f32.mrb[5].mxu1  ;;  %685 = vst [vmem:[%s1585_s2 + $0x48] sm:$0xff] %v241_v56 }
  0xe7   :  { %687 = vst.msk [vmem:[%s1585_s2 + $0x58] sm:$0xff] %vm678_vm4, %v498_v57 }
  0xe8   :  { %v245_v58 = vpop.f32.mrb[6].mxu0 }
  0xe9   :  { %v502_v59 = vpop.f32.mrb[6].mxu1  ;;  %688 = vst [vmem:[%s1585_s2 + $0x60] sm:$0xff] %v245_v58  ;;  %v247_v60 = vpop.f32.mrb[7].mxu0 }
  0xea   :  { %690 = vst [vmem:[%s1585_s2 + $0x70] sm:$0xff] %v502_v59  ;;  %v504_v61 = vpop.f32.mrb[7].mxu1  ;;  %689 = vst [vmem:[%s1585_s2 + $0x68] sm:$0xff] %v247_v60 }
  0xeb   :  { %691 = vst.msk [vmem:[%s1585_s2 + $0x78] sm:$0xff] %vm678_vm4, %v504_v61 }
  0xec   :  { %v251_v62 = vpop.f32.mrb[8].mxu0 }
  0xed   :  { %v508_v63 = vpop.f32.mrb[8].mxu1  ;;  %692 = vst [vmem:[%s1585_s2 + $0x80] sm:$0xff] %v251_v62  ;;  %v253_v0 = vpop.f32.mrb[9].mxu0 }
  0xee   :  { %694 = vst [vmem:[%s1585_s2 + $0x90] sm:$0xff] %v508_v63  ;;  %v510_v1 = vpop.f32.mrb[9].mxu1  ;;  %693 = vst [vmem:[%s1585_s2 + $0x88] sm:$0xff] %v253_v0 }
  0xef   :  { %695 = vst.msk [vmem:[%s1585_s2 + $0x98] sm:$0xff] %vm678_vm4, %v510_v1 }
  0xf0   :  { %v257_v2 = vpop.f32.mrb[10].mxu0 }
  0xf1   :  { %v514_v3 = vpop.f32.mrb[10].mxu1  ;;  %696 = vst [vmem:[%s1585_s2 + $0xa0] sm:$0xff] %v257_v2  ;;  %v259_v4 = vpop.f32.mrb[11].mxu0 }
  0xf2   :  { %698 = vst [vmem:[%s1585_s2 + $0xb0] sm:$0xff] %v514_v3  ;;  %v516_v5 = vpop.f32.mrb[11].mxu1  ;;  %697 = vst [vmem:[%s1585_s2 + $0xa8] sm:$0xff] %v259_v4 }
  0xf3   :  { %699 = vst.msk [vmem:[%s1585_s2 + $0xb8] sm:$0xff] %vm678_vm4, %v516_v5 }
  0xf4   :  { %v263_v6 = vpop.f32.mrb[12].mxu0 }
  0xf5   :  { %v520_v7 = vpop.f32.mrb[12].mxu1  ;;  %700 = vst [vmem:[%s1585_s2 + $0xc0] sm:$0xff] %v263_v6  ;;  %v265_v8 = vpop.f32.mrb[13].mxu0 }
  0xf6   :  { %702 = vst [vmem:[%s1585_s2 + $0xd0] sm:$0xff] %v520_v7  ;;  %v522_v9 = vpop.f32.mrb[13].mxu1  ;;  %701 = vst [vmem:[%s1585_s2 + $0xc8] sm:$0xff] %v265_v8 }
  0xf7   :  { %703 = vst.msk [vmem:[%s1585_s2 + $0xd8] sm:$0xff] %vm678_vm4, %v522_v9 }
  0xf8   :  { %v269_v10 = vpop.f32.mrb[14].mxu0 }
  0xf9   :  { %v526_v11 = vpop.f32.mrb[14].mxu1  ;;  %704 = vst [vmem:[%s1585_s2 + $0xe0] sm:$0xff] %v269_v10  ;;  %v271_v12 = vpop.f32.mrb[15].mxu0 }
  0xfa   :  { %706 = vst [vmem:[%s1585_s2 + $0xf0] sm:$0xff] %v526_v11  ;;  %v528_v13 = vpop.f32.mrb[15].mxu1  ;;  %705 = vst [vmem:[%s1585_s2 + $0xe8] sm:$0xff] %v271_v12 }
  0xfb   :  { %707 = vst.msk [vmem:[%s1585_s2 + $0xf8] sm:$0xff] %vm678_vm4, %v528_v13 }
  0xfc   :  { %v275_v14 = vpop.f32.mrb[16].mxu0 }
  0xfd   :  { %v532_v15 = vpop.f32.mrb[16].mxu1  ;;  %708 = vst [vmem:[%s1585_s2 + $0x100] sm:$0xff] %v275_v14  ;;  %v277_v16 = vpop.f32.mrb[17].mxu0 }
  0xfe   :  { %710 = vst [vmem:[%s1585_s2 + $0x110] sm:$0xff] %v532_v15  ;;  %v534_v17 = vpop.f32.mrb[17].mxu1  ;;  %709 = vst [vmem:[%s1585_s2 + $0x108] sm:$0xff] %v277_v16 }
  0xff   :  { %711 = vst.msk [vmem:[%s1585_s2 + $0x118] sm:$0xff] %vm678_vm4, %v534_v17 }
 0x100   :  { %v281_v18 = vpop.f32.mrb[18].mxu0 }
 0x101   :  { %v538_v19 = vpop.f32.mrb[18].mxu1  ;;  %712 = vst [vmem:[%s1585_s2 + $0x120] sm:$0xff] %v281_v18  ;;  %v283_v20 = vpop.f32.mrb[19].mxu0 }
 0x102   :  { %714 = vst [vmem:[%s1585_s2 + $0x130] sm:$0xff] %v538_v19  ;;  %v540_v21 = vpop.f32.mrb[19].mxu1  ;;  %713 = vst [vmem:[%s1585_s2 + $0x128] sm:$0xff] %v283_v20 }
 0x103   :  { %715 = vst.msk [vmem:[%s1585_s2 + $0x138] sm:$0xff] %vm678_vm4, %v540_v21 }
 0x104   :  { %v287_v22 = vpop.f32.mrb[20].mxu0 }
 0x105   :  { %v544_v23 = vpop.f32.mrb[20].mxu1  ;;  %716 = vst [vmem:[%s1585_s2 + $0x140] sm:$0xff] %v287_v22  ;;  %v289_v24 = vpop.f32.mrb[21].mxu0 }
 0x106   :  { %718 = vst [vmem:[%s1585_s2 + $0x150] sm:$0xff] %v544_v23  ;;  %v546_v25 = vpop.f32.mrb[21].mxu1  ;;  %717 = vst [vmem:[%s1585_s2 + $0x148] sm:$0xff] %v289_v24 }
 0x107   :  { %719 = vst.msk [vmem:[%s1585_s2 + $0x158] sm:$0xff] %vm678_vm4, %v546_v25 }
 0x108   :  { %v293_v26 = vpop.f32.mrb[22].mxu0 }
 0x109   :  { %v550_v27 = vpop.f32.mrb[22].mxu1  ;;  %720 = vst [vmem:[%s1585_s2 + $0x160] sm:$0xff] %v293_v26  ;;  %v295_v28 = vpop.f32.mrb[23].mxu0 }
 0x10a   :  { %722 = vst [vmem:[%s1585_s2 + $0x170] sm:$0xff] %v550_v27  ;;  %v552_v29 = vpop.f32.mrb[23].mxu1  ;;  %721 = vst [vmem:[%s1585_s2 + $0x168] sm:$0xff] %v295_v28 }
 0x10b   :  { %723 = vst.msk [vmem:[%s1585_s2 + $0x178] sm:$0xff] %vm678_vm4, %v552_v29 }
 0x10c   :  { %v299_v30 = vpop.f32.mrb[24].mxu0 }
 0x10d   :  { %v556_v31 = vpop.f32.mrb[24].mxu1  ;;  %724 = vst [vmem:[%s1585_s2 + $0x180] sm:$0xff] %v299_v30  ;;  %v301_v32 = vpop.f32.mrb[25].mxu0 }
 0x10e   :  { %726 = vst [vmem:[%s1585_s2 + $0x190] sm:$0xff] %v556_v31  ;;  %v558_v33 = vpop.f32.mrb[25].mxu1  ;;  %725 = vst [vmem:[%s1585_s2 + $0x188] sm:$0xff] %v301_v32 }
 0x10f   :  { %727 = vst.msk [vmem:[%s1585_s2 + $0x198] sm:$0xff] %vm678_vm4, %v558_v33 }
 0x110   :  { %v305_v34 = vpop.f32.mrb[26].mxu0 }
 0x111   :  { %v562_v35 = vpop.f32.mrb[26].mxu1  ;;  %728 = vst [vmem:[%s1585_s2 + $0x1a0] sm:$0xff] %v305_v34  ;;  %v307_v36 = vpop.f32.mrb[27].mxu0 }
 0x112   :  { %730 = vst [vmem:[%s1585_s2 + $0x1b0] sm:$0xff] %v562_v35  ;;  %v564_v37 = vpop.f32.mrb[27].mxu1  ;;  %729 = vst [vmem:[%s1585_s2 + $0x1a8] sm:$0xff] %v307_v36 }
 0x113   :  { %731 = vst.msk [vmem:[%s1585_s2 + $0x1b8] sm:$0xff] %vm678_vm4, %v564_v37 }
 0x114   :  { %v311_v38 = vpop.f32.mrb[28].mxu0 }
 0x115   :  { %v568_v39 = vpop.f32.mrb[28].mxu1  ;;  %732 = vst [vmem:[%s1585_s2 + $0x1c0] sm:$0xff] %v311_v38  ;;  %v313_v40 = vpop.f32.mrb[29].mxu0 }
 0x116   :  { %734 = vst [vmem:[%s1585_s2 + $0x1d0] sm:$0xff] %v568_v39  ;;  %v570_v41 = vpop.f32.mrb[29].mxu1  ;;  %733 = vst [vmem:[%s1585_s2 + $0x1c8] sm:$0xff] %v313_v40 }
 0x117   :  { %735 = vst.msk [vmem:[%s1585_s2 + $0x1d8] sm:$0xff] %vm678_vm4, %v570_v41 }
 0x118   :  { %v317_v42 = vpop.f32.mrb[30].mxu0 }
 0x119   :  { %v574_v43 = vpop.f32.mrb[30].mxu1  ;;  %736 = vst [vmem:[%s1585_s2 + $0x1e0] sm:$0xff] %v317_v42  ;;  %v319_v44 = vpop.f32.mrb[31].mxu0 }
 0x11a   :  { %738 = vst [vmem:[%s1585_s2 + $0x1f0] sm:$0xff] %v574_v43  ;;  %v576_v45 = vpop.f32.mrb[31].mxu1  ;;  %737 = vst [vmem:[%s1585_s2 + $0x1e8] sm:$0xff] %v319_v44 }
 0x11b   :  { %739 = vst.msk [vmem:[%s1585_s2 + $0x1f8] sm:$0xff] %vm678_vm4, %v576_v45 }
 0x11c   :  { %v323_v46 = vpop.f32.mrb[32].mxu0 }
 0x11d   :  { %v580_v47 = vpop.f32.mrb[32].mxu1  ;;  %740 = vst [vmem:[%s1585_s2 + $0x200] sm:$0xff] %v323_v46  ;;  %v325_v48 = vpop.f32.mrb[33].mxu0 }
 0x11e   :  { %742 = vst [vmem:[%s1585_s2 + $0x210] sm:$0xff] %v580_v47  ;;  %v582_v49 = vpop.f32.mrb[33].mxu1  ;;  %741 = vst [vmem:[%s1585_s2 + $0x208] sm:$0xff] %v325_v48 }
 0x11f   :  { %743 = vst.msk [vmem:[%s1585_s2 + $0x218] sm:$0xff] %vm678_vm4, %v582_v49 }
 0x120   :  { %v329_v50 = vpop.f32.mrb[34].mxu0 }
 0x121   :  { %v586_v51 = vpop.f32.mrb[34].mxu1  ;;  %744 = vst [vmem:[%s1585_s2 + $0x220] sm:$0xff] %v329_v50  ;;  %v331_v52 = vpop.f32.mrb[35].mxu0 }
 0x122   :  { %746 = vst [vmem:[%s1585_s2 + $0x230] sm:$0xff] %v586_v51  ;;  %v588_v53 = vpop.f32.mrb[35].mxu1  ;;  %745 = vst [vmem:[%s1585_s2 + $0x228] sm:$0xff] %v331_v52 }
 0x123   :  { %747 = vst.msk [vmem:[%s1585_s2 + $0x238] sm:$0xff] %vm678_vm4, %v588_v53 }
 0x124   :  { %v335_v54 = vpop.f32.mrb[36].mxu0 }
 0x125   :  { %v592_v55 = vpop.f32.mrb[36].mxu1  ;;  %748 = vst [vmem:[%s1585_s2 + $0x240] sm:$0xff] %v335_v54  ;;  %v337_v56 = vpop.f32.mrb[37].mxu0 }
 0x126   :  { %750 = vst [vmem:[%s1585_s2 + $0x250] sm:$0xff] %v592_v55  ;;  %v594_v57 = vpop.f32.mrb[37].mxu1  ;;  %749 = vst [vmem:[%s1585_s2 + $0x248] sm:$0xff] %v337_v56 }
 0x127   :  { %751 = vst.msk [vmem:[%s1585_s2 + $0x258] sm:$0xff] %vm678_vm4, %v594_v57 }
 0x128   :  { %v341_v58 = vpop.f32.mrb[38].mxu0 }
 0x129   :  { %v598_v59 = vpop.f32.mrb[38].mxu1  ;;  %752 = vst [vmem:[%s1585_s2 + $0x260] sm:$0xff] %v341_v58  ;;  %v343_v60 = vpop.f32.mrb[39].mxu0 }
 0x12a   :  { %754 = vst [vmem:[%s1585_s2 + $0x270] sm:$0xff] %v598_v59  ;;  %v600_v61 = vpop.f32.mrb[39].mxu1  ;;  %753 = vst [vmem:[%s1585_s2 + $0x268] sm:$0xff] %v343_v60 }
 0x12b   :  { %755 = vst.msk [vmem:[%s1585_s2 + $0x278] sm:$0xff] %vm678_vm4, %v600_v61 }
 0x12c   :  { %v347_v62 = vpop.f32.mrb[40].mxu0 }
 0x12d   :  { %v604_v63 = vpop.f32.mrb[40].mxu1  ;;  %756 = vst [vmem:[%s1585_s2 + $0x280] sm:$0xff] %v347_v62  ;;  %v349_v0 = vpop.f32.mrb[41].mxu0 }
 0x12e   :  { %758 = vst [vmem:[%s1585_s2 + $0x290] sm:$0xff] %v604_v63  ;;  %v606_v1 = vpop.f32.mrb[41].mxu1  ;;  %757 = vst [vmem:[%s1585_s2 + $0x288] sm:$0xff] %v349_v0 }
 0x12f   :  { %759 = vst.msk [vmem:[%s1585_s2 + $0x298] sm:$0xff] %vm678_vm4, %v606_v1 }
 0x130   :  { %v353_v2 = vpop.f32.mrb[42].mxu0 }
 0x131   :  { %v610_v3 = vpop.f32.mrb[42].mxu1  ;;  %760 = vst [vmem:[%s1585_s2 + $0x2a0] sm:$0xff] %v353_v2  ;;  %v355_v4 = vpop.f32.mrb[43].mxu0 }
 0x132   :  { %762 = vst [vmem:[%s1585_s2 + $0x2b0] sm:$0xff] %v610_v3  ;;  %v612_v5 = vpop.f32.mrb[43].mxu1  ;;  %761 = vst [vmem:[%s1585_s2 + $0x2a8] sm:$0xff] %v355_v4 }
 0x133   :  { %763 = vst.msk [vmem:[%s1585_s2 + $0x2b8] sm:$0xff] %vm678_vm4, %v612_v5 }
 0x134   :  { %v359_v6 = vpop.f32.mrb[44].mxu0 }
 0x135   :  { %v616_v7 = vpop.f32.mrb[44].mxu1  ;;  %764 = vst [vmem:[%s1585_s2 + $0x2c0] sm:$0xff] %v359_v6  ;;  %v361_v8 = vpop.f32.mrb[45].mxu0 }
 0x136   :  { %766 = vst [vmem:[%s1585_s2 + $0x2d0] sm:$0xff] %v616_v7  ;;  %v618_v9 = vpop.f32.mrb[45].mxu1  ;;  %765 = vst [vmem:[%s1585_s2 + $0x2c8] sm:$0xff] %v361_v8 }
 0x137   :  { %767 = vst.msk [vmem:[%s1585_s2 + $0x2d8] sm:$0xff] %vm678_vm4, %v618_v9 }
 0x138   :  { %v365_v10 = vpop.f32.mrb[46].mxu0 }
 0x139   :  { %v622_v11 = vpop.f32.mrb[46].mxu1  ;;  %768 = vst [vmem:[%s1585_s2 + $0x2e0] sm:$0xff] %v365_v10  ;;  %v367_v12 = vpop.f32.mrb[47].mxu0 }
 0x13a   :  { %770 = vst [vmem:[%s1585_s2 + $0x2f0] sm:$0xff] %v622_v11  ;;  %v624_v13 = vpop.f32.mrb[47].mxu1  ;;  %769 = vst [vmem:[%s1585_s2 + $0x2e8] sm:$0xff] %v367_v12 }
 0x13b   :  { %771 = vst.msk [vmem:[%s1585_s2 + $0x2f8] sm:$0xff] %vm678_vm4, %v624_v13 }
 0x13c   :  { %v371_v14 = vpop.f32.mrb[48].mxu0 }
 0x13d   :  { %v628_v15 = vpop.f32.mrb[48].mxu1  ;;  %772 = vst [vmem:[%s1585_s2 + $0x300] sm:$0xff] %v371_v14  ;;  %v373_v16 = vpop.f32.mrb[49].mxu0 }
 0x13e   :  { %774 = vst [vmem:[%s1585_s2 + $0x310] sm:$0xff] %v628_v15  ;;  %v630_v17 = vpop.f32.mrb[49].mxu1  ;;  %773 = vst [vmem:[%s1585_s2 + $0x308] sm:$0xff] %v373_v16 }
 0x13f   :  { %775 = vst.msk [vmem:[%s1585_s2 + $0x318] sm:$0xff] %vm678_vm4, %v630_v17 }
 0x140   :  { %v377_v18 = vpop.f32.mrb[50].mxu0 }
 0x141   :  { %v634_v19 = vpop.f32.mrb[50].mxu1  ;;  %776 = vst [vmem:[%s1585_s2 + $0x320] sm:$0xff] %v377_v18  ;;  %v379_v20 = vpop.f32.mrb[51].mxu0 }
 0x142   :  { %778 = vst [vmem:[%s1585_s2 + $0x330] sm:$0xff] %v634_v19  ;;  %v636_v21 = vpop.f32.mrb[51].mxu1  ;;  %777 = vst [vmem:[%s1585_s2 + $0x328] sm:$0xff] %v379_v20 }
 0x143   :  { %779 = vst.msk [vmem:[%s1585_s2 + $0x338] sm:$0xff] %vm678_vm4, %v636_v21 }
 0x144   :  { %v383_v22 = vpop.f32.mrb[52].mxu0 }
 0x145   :  { %v640_v23 = vpop.f32.mrb[52].mxu1  ;;  %780 = vst [vmem:[%s1585_s2 + $0x340] sm:$0xff] %v383_v22  ;;  %v385_v24 = vpop.f32.mrb[53].mxu0 }
 0x146   :  { %782 = vst [vmem:[%s1585_s2 + $0x350] sm:$0xff] %v640_v23  ;;  %v642_v25 = vpop.f32.mrb[53].mxu1  ;;  %781 = vst [vmem:[%s1585_s2 + $0x348] sm:$0xff] %v385_v24 }
 0x147   :  { %783 = vst.msk [vmem:[%s1585_s2 + $0x358] sm:$0xff] %vm678_vm4, %v642_v25 }
 0x148   :  { %v389_v26 = vpop.f32.mrb[54].mxu0 }
 0x149   :  { %v646_v27 = vpop.f32.mrb[54].mxu1  ;;  %784 = vst [vmem:[%s1585_s2 + $0x360] sm:$0xff] %v389_v26  ;;  %v391_v28 = vpop.f32.mrb[55].mxu0 }
 0x14a   :  { %786 = vst [vmem:[%s1585_s2 + $0x370] sm:$0xff] %v646_v27  ;;  %v648_v29 = vpop.f32.mrb[55].mxu1  ;;  %785 = vst [vmem:[%s1585_s2 + $0x368] sm:$0xff] %v391_v28 }
 0x14b   :  { %787 = vst.msk [vmem:[%s1585_s2 + $0x378] sm:$0xff] %vm678_vm4, %v648_v29 }
 0x14c   :  { %v395_v30 = vpop.f32.mrb[56].mxu0 }
 0x14d   :  { %v652_v31 = vpop.f32.mrb[56].mxu1  ;;  %788 = vst [vmem:[%s1585_s2 + $0x380] sm:$0xff] %v395_v30  ;;  %v397_v32 = vpop.f32.mrb[57].mxu0 }
 0x14e   :  { %790 = vst [vmem:[%s1585_s2 + $0x390] sm:$0xff] %v652_v31  ;;  %v654_v33 = vpop.f32.mrb[57].mxu1  ;;  %789 = vst [vmem:[%s1585_s2 + $0x388] sm:$0xff] %v397_v32 }
 0x14f   :  { %791 = vst.msk [vmem:[%s1585_s2 + $0x398] sm:$0xff] %vm678_vm4, %v654_v33 }
 0x150   :  { %v401_v34 = vpop.f32.mrb[58].mxu0 }
 0x151   :  { %v658_v35 = vpop.f32.mrb[58].mxu1  ;;  %792 = vst [vmem:[%s1585_s2 + $0x3a0] sm:$0xff] %v401_v34  ;;  %v403_v36 = vpop.f32.mrb[59].mxu0 }
 0x152   :  { %794 = vst [vmem:[%s1585_s2 + $0x3b0] sm:$0xff] %v658_v35  ;;  %v660_v37 = vpop.f32.mrb[59].mxu1  ;;  %793 = vst [vmem:[%s1585_s2 + $0x3a8] sm:$0xff] %v403_v36 }
 0x153   :  { %795 = vst.msk [vmem:[%s1585_s2 + $0x3b8] sm:$0xff] %vm678_vm4, %v660_v37 }
 0x154   :  { %v407_v38 = vpop.f32.mrb[60].mxu0 }
 0x155   :  { %v664_v39 = vpop.f32.mrb[60].mxu1  ;;  %796 = vst [vmem:[%s1585_s2 + $0x3c0] sm:$0xff] %v407_v38  ;;  %v409_v40 = vpop.f32.mrb[61].mxu0 }
 0x156   :  { %798 = vst [vmem:[%s1585_s2 + $0x3d0] sm:$0xff] %v664_v39  ;;  %v666_v41 = vpop.f32.mrb[61].mxu1  ;;  %797 = vst [vmem:[%s1585_s2 + $0x3c8] sm:$0xff] %v409_v40 }
 0x157   :  { %799 = vst.msk [vmem:[%s1585_s2 + $0x3d8] sm:$0xff] %vm678_vm4, %v666_v41 }
 0x158   :  { %v413_v42 = vpop.f32.mrb[62].mxu0 }
 0x159   :  { %v670_v43 = vpop.f32.mrb[62].mxu1  ;;  %800 = vst [vmem:[%s1585_s2 + $0x3e0] sm:$0xff] %v413_v42  ;;  %v415_v44 = vpop.f32.mrb[63].mxu0 }
 0x15a   :  { %802 = vst [vmem:[%s1585_s2 + $0x3f0] sm:$0xff] %v670_v43  ;;  %v672_v45 = vpop.f32.mrb[63].mxu1  ;;  %801 = vst [vmem:[%s1585_s2 + $0x3e8] sm:$0xff] %v415_v44 }
 0x15b   :  { %803 = vst.msk [vmem:[%s1585_s2 + $0x3f8] sm:$0xff] %vm678_vm4, %v672_v45 }

</bundles_post_ra>
